<compile_context>
chip_gen: v7x
topology: tpu7x:2x2x1
jax: 0.10.0
libtpu: 0.0.40
codegen_flags: <defaults>
</compile_context>

<pallas_src>
import math
from functools import partial

import jax
import jax.numpy as jnp
from jax.experimental import pallas as pl
from jax.experimental.pallas import tpu as pltpu


def inverse_softplus(x):
    return math.log(math.exp(x) - 1.0)


def _round_up(x, m):
    return ((x + m - 1) // m) * m


def _cdiv(a, b):
    return -(-a // b)


def _vmem_capacity_bytes():
    try:
        cap = int(pltpu.get_tpu_info().vmem_capacity_bytes)
        if cap > 0:
            return cap
    except Exception:
        pass
    return 64 << 20   # conservative (v7x-sized) fallback if the query is unavailable


# ----------------------------- Pallas kernel --------------------------------
def _mm_bias_kernel(a_ref, w_ref, b_ref, o_ref, acc_ref):
    """(tm, tk) @ (tk, tn) MXU contraction, f32 accumulation, + bias broadcast."""
    k = pl.program_id(2)

    @pl.when(k == 0)
    def _():
        acc_ref[...] = jnp.zeros_like(acc_ref)

    acc_ref[...] += jnp.dot(a_ref[...], w_ref[...],
                            preferred_element_type=jnp.float32)

    @pl.when(k == pl.num_programs(2) - 1)
    def _():
        o_ref[...] = (acc_ref[...] + b_ref[...]).astype(o_ref.dtype)


# ----------------------------- tiling planner --------------------------------
def _plan_tiles(M, K, O, in_itemsize, out_itemsize, vmem_cap):
    """Pick (tm, tn, tk) + grid so double-buffered blocks fit the VMEM budget."""
    # Output-channel tile: lane-dense 128 minimum; 256/512 for the 256-wide MXU
    # (v6e/v7x) when Cout is large.
    if O <= 128:
        tn = 128
    elif O <= 512:
        tn = 256
    else:
        tn = 512
    Op = _round_up(O, tn)
    n_n = Op // tn

    budget = int(vmem_cap * 0.6)           # block buffers; headroom for compiler scratch
    tm_cap = 1024 if vmem_cap > (96 << 20) else 512   # v5e/v6e: 128 MiB; v7x: 64 MiB

    def footprint(tm, tk):
        # The pipeline double-buffers every operand by default; the accumulator
        # scratch is a single f32 buffer.
        return (2 * tm * tk * in_itemsize      # patch tile
                + 2 * tk * tn * in_itemsize    # weight tile
                + 2 * tn * 4                   # bias tile
                + 2 * tm * tn * out_itemsize   # output tile
                + tm * tn * 4)                 # accumulator scratch

    # Prefer full-K residency (no K pad, single reduction step); fall back to a
    # K reduction axis (128-multiple tiles) rather than shrinking tm below 256.
    tk_cands = [K] + [t for t in (2048, 1024, 512, 256, 128) if t < K]
    tm, tk = None, None
    for tk_try in tk_cands:
        tm_try = tm_cap
        while tm_try > 256 and footprint(tm_try, tk_try) > budget:
            tm_try //= 2
        if footprint(tm_try, tk_try) <= budget:
            tm, tk = tm_try, tk_try
            break
    if tm is None:                          # extreme K*O: shrink tm further
        tk = tk_cands[-1]
        tm = tm_cap
        while tm > 64 and footprint(tm, tk) > budget:
            tm //= 2

    Kp = K if tk == K else _round_up(K, tk)
    grid_k = Kp // tk

    # Balance the M tiles (no nearly-empty padded tail) and keep >= 2 parallel
    # grid points when M allows so both v7x TensorCores get work.
    n_m = max(1, _cdiv(M, tm))
    if n_m * n_n < 2 and M >= 256:
        n_m = 2
    tm = max(16, _round_up(_cdiv(M, n_m), 16))
    Mp = n_m * tm

    return dict(tm=tm, tn=tn, tk=tk, n_m=n_m, n_n=n_n, grid_k=grid_k,
                Mp=Mp, Kp=Kp, Op=Op, footprint=footprint(tm, tk))


def _matmul_bias(patches, w, b, *, operand_dtype=jnp.bfloat16,
                 out_dtype=jnp.float32):
    """patches: (M, K), w: (K, O) f32, b: (1, O) f32 -> (M, O) out_dtype."""
    M, K = patches.shape
    O = w.shape[1]

    cap = _vmem_capacity_bytes()
    p = _plan_tiles(M, K, O,
                    in_itemsize=jnp.dtype(operand_dtype).itemsize,
                    out_itemsize=jnp.dtype(out_dtype).itemsize,
                    vmem_cap=cap)
    tm, tn, tk = p["tm"], p["tn"], p["tk"]
    Mp, Kp, Op = p["Mp"], p["Kp"], p["Op"]

    # Patches arrive already in operand_dtype (bf16) and stay unpadded in K on
    # the full-K path, so the cast is a no-op and only a small (fused) M-row
    # pad remains; weight/bias are tiny.
    a_p = jnp.pad(patches.astype(operand_dtype), ((0, Mp - M), (0, Kp - K)))
    w_p = jnp.pad(w.astype(operand_dtype), ((0, Kp - K), (0, Op - O)))
    b_p = jnp.pad(b.astype(jnp.float32), ((0, 0), (0, Op - O)))

    # Generation-aware scoped-VMEM limit: never below the true double-buffered
    # footprint, capped under the physical capacity (64 MiB v7x / 128 MiB v5e,v6e).
    limit_ceiling = (56 << 20) if cap <= (64 << 20) else (104 << 20)
    vmem_limit = int(min(max(int(1.35 * p["footprint"]), 32 << 20), limit_ceiling))

    # NOTE: pl.Buffered(1) on the weight/bias specs would halve their residency,
    # but the weight block index changes along the K axis (it needs double
    # buffering for pipelining) and the bias is tiny, so the budget above simply
    # accounts for 2 buffers per operand instead.
    out = pl.pallas_call(
        _mm_bias_kernel,
        out_shape=jax.ShapeDtypeStruct((Mp, Op), out_dtype),
        grid_spec=pltpu.PrefetchScalarGridSpec(
            num_scalar_prefetch=0,
            grid=(p["n_m"], p["n_n"], p["grid_k"]),
            in_specs=[
                pl.BlockSpec((tm, tk), lambda i, j, k: (i, k)),   # patch tile
                pl.BlockSpec((tk, tn), lambda i, j, k: (k, j)),   # effective weight
                pl.BlockSpec((1, tn), lambda i, j, k: (0, j)),    # effective bias
            ],
            out_specs=pl.BlockSpec((tm, tn), lambda i, j, k: (i, j)),
            scratch_shapes=[pltpu.VMEM((tm, tn), jnp.float32)],
        ),
        compiler_params=pltpu.CompilerParams(
            dimension_semantics=("parallel", "parallel", "arbitrary"),
            vmem_limit_bytes=vmem_limit),
    )(a_p, w_p, b_p)
    return out[:M, :O]


# ------------------------------ glue (im2col) --------------------------------
@partial(jax.jit, static_argnames=("ksize", "stride", "padding"))
def _bayes_conv_forward(x, w_eff_t, b_eff, ksize, stride, padding):
    """x: (N, Cin, H, W) f32 NCHW -> (N, Cout, OH, OW) f32 NCHW."""
    n, c, h, w = x.shape
    out_ch = w_eff_t.shape[1]
    oh = (h + 2 * padding - ksize) // stride + 1
    ow = (w + 2 * padding - ksize) // stride + 1

    # Single pass over the (small) input: NCHW -> NHWC + bf16 cast, spatial pad.
    x_nhwc = jnp.transpose(x, (0, 2, 3, 1)).astype(jnp.bfloat16)
    xp = jnp.pad(x_nhwc, ((0, 0), (padding, padding), (padding, padding), (0, 0)))

    # Shifted strided slices stacked into the trailing axis write the big patch
    # matrix exactly once, already in its final (M, K) bf16 layout with the
    # PyTorch (c, kh, kw) flat-K order (matching the (O, Cin, KH, KW) weight).
    cols = []
    for i in range(ksize):
        for j in range(ksize):
            cols.append(xp[:, i:i + stride * oh:stride,
                           j:j + stride * ow:stride, :])      # (N, OH, OW, C)
    patches = jnp.stack(cols, axis=-1).reshape(n * oh * ow, c * ksize * ksize)

    out = _matmul_bias(patches, w_eff_t, b_eff.reshape(1, out_ch))   # (M, O) f32
    # TODO(synk): keeping activations NHWC end-to-end (returning (N,OH,OW,Cout)
    # straight from the kernel) would drop this final layout transpose; it is
    # kept so the module matches PyTorch's NCHW output exactly.
    return out.reshape(n, oh, ow, out_ch).transpose(0, 3, 1, 2)


# --------------------------- BayesianConv2d module ---------------------------
class BayesianConv2dPallas:
    """Mirrors BayesianConv2d.forward (MC / MAP) for a Conv2d posterior.

    Only posterior_{mean,rho} matter for forward(); prior params exist solely
    for the KL terms, which are not part of forward().
    """

    # TODO(synk): dilation > 1 and groups > 1 are not implemented (the module's
    # conv defaults are assumed).

    def __init__(self, in_ch, out_ch, ksize, stride, padding, prior_stddev, key):
        self.stride = stride
        self.padding = padding
        self.ksize = ksize
        k_w, k_b = jax.random.split(key)
        fan_in = in_ch * ksize * ksize
        bound = 1.0 / math.sqrt(fan_in)
        # Deterministic "posterior mean" init (PyTorch Conv2d-style uniform).
        self.w_mean = jax.random.uniform(
            k_w, (out_ch, in_ch, ksize, ksize), jnp.float32, -bound, bound)
        self.b_mean = jax.random.uniform(
            k_b, (out_ch,), jnp.float32, -bound, bound)
        rho0 = inverse_softplus(prior_stddev)
        self.w_rho = jnp.full_like(self.w_mean, rho0)
        self.b_rho = jnp.full_like(self.b_mean, rho0)
        # (K, O)-layout weights precomputed once (PyTorch (Cin, KH, KW) flat order).
        K = in_ch * ksize * ksize
        self.w_mean_t = self.w_mean.reshape(out_ch, K).T   # (K, O)
        self.w_rho_t = self.w_rho.reshape(out_ch, K).T     # (K, O)

    def __call__(self, x, mode, noise_key=None):
        if mode == 'MC':
            kw_, kb_ = jax.random.split(noise_key)
            wn = jax.random.normal(kw_, self.w_mean_t.shape, jnp.float32)
            bn = jax.random.normal(kb_, self.b_mean.shape, jnp.float32)
            # One-shot perturbation in f32, hoisted out of the kernel's grid loop.
            w_eff = self.w_mean_t + jax.nn.softplus(self.w_rho_t) * wn
            b_eff = self.b_mean + jax.nn.softplus(self.b_rho) * bn
        elif mode == 'MAP':
            # MAP == posterior-mean conv; skip the zero-noise/softplus path.
            w_eff = self.w_mean_t
            b_eff = self.b_mean
        else:
            raise ValueError(mode)
        return _bayes_conv_forward(x, w_eff, b_eff,
                                   self.ksize, self.stride, self.padding)


# ---------------------------------- main -------------------------------------
if __name__ == "__main__":
    key = jax.random.PRNGKey(0)
    k_x, k_params, k_noise = jax.random.split(key, 3)

    N, Cin, H, W = 2, 4, 16, 16
    Cout, ksize, stride, padding = 8, 3, 1, 1
    prior_stddev = 0.1

    x = jax.random.normal(k_x, (N, Cin, H, W), jnp.float32)
    layer = BayesianConv2dPallas(Cin, Cout, ksize, stride, padding,
                                 prior_stddev, k_params)

    y_map = layer(x, mode='MAP')
    y_mc = layer(x, mode='MC', noise_key=k_noise)
    jax.block_until_ready(y_map)
    jax.block_until_ready(y_mc)

    assert y_map.shape == (N, Cout, H, W)
    assert y_mc.shape == (N, Cout, H, W)

    # MAP mode == posterior_mean(x): compare against XLA's conv.  Tolerance is
    # relaxed because the kernel uses bf16 matmul operands (f32 accumulation).
    y_ref = jax.lax.conv_general_dilated(
        x, layer.w_mean, window_strides=(stride, stride),
        padding=[(padding, padding), (padding, padding)],
        dimension_numbers=('NCHW', 'OIHW', 'NCHW'),
    ) + layer.b_mean[None, :, None, None]
    assert jnp.allclose(y_map, y_ref, atol=5e-2, rtol=5e-2), \
        float(jnp.max(jnp.abs(y_map - y_ref)))

    # MC mode: replicate the (deterministic) perturbation outside the layer
    # and compare against XLA's conv with the perturbed weights.
    kw_, kb_ = jax.random.split(k_noise)
    wn = jax.random.normal(kw_, layer.w_mean_t.shape, jnp.float32)
    bn = jax.random.normal(kb_, layer.b_mean.shape, jnp.float32)
    w_eff_t = layer.w_mean_t + jax.nn.softplus(layer.w_rho_t) * wn
    w_eff_oihw = w_eff_t.T.reshape(Cout, Cin, ksize, ksize)
    b_eff = layer.b_mean + jax.nn.softplus(layer.b_rho) * bn
    y_mc_ref = jax.lax.conv_general_dilated(
        x, w_eff_oihw, window_strides=(stride, stride),
        padding=[(padding, padding), (padding, padding)],
        dimension_numbers=('NCHW', 'OIHW', 'NCHW'),
    ) + b_eff[None, :, None, None]
    assert jnp.allclose(y_mc, y_mc_ref, atol=5e-2, rtol=5e-2), \
        float(jnp.max(jnp.abs(y_mc - y_mc_ref)))

    print("KERNEL_OK")
</pallas_src>

<mosaic_0001>
module attributes {stable_mosaic.version = 11 : i64} {
  func.func @_mm_bias_kernel(%arg0: i32, %arg1: i32, %arg2: i32, %arg3: memref<256x36xbf16, #tpu.memory_space<vmem>>, %arg4: memref<36x128xbf16, #tpu.memory_space<vmem>>, %arg5: memref<1x128xf32, #tpu.memory_space<vmem>>, %arg6: memref<256x128xf32, #tpu.memory_space<vmem>>, %arg7: memref<256x128xf32, #tpu.memory_space<vmem>>) attributes {dimension_semantics = [#tpu.dimension_semantics<parallel>, #tpu.dimension_semantics<parallel>, #tpu.dimension_semantics<arbitrary>], iteration_bounds = array<i64: 2, 1, 1>, scalar_prefetch = 0 : i64, scratch_operands = 1 : i64, tpu.core_type = #tpu.core_type<tc>, window_params = [{transform_indices = @transform_0, window_bounds = array<i64: 256, 36>}, {transform_indices = @transform_1, window_bounds = array<i64: 36, 128>}, {transform_indices = @transform_2, window_bounds = array<i64: 1, 128>}, {transform_indices = @transform_3, window_bounds = array<i64: 256, 128>}]} {
    %c0_i32 = arith.constant 0 : i32
    %0 = arith.cmpi eq, %arg2, %c0_i32 : i32
    %1 = arith.extui %0 : i1 to i32
    %c0_i32_0 = arith.constant 0 : i32
    %2 = arith.cmpi ne, %1, %c0_i32_0 : i32
    scf.if %2 {
      %cst_10 = arith.constant 0.000000e+00 : f32
      %12 = vector.broadcast %cst_10 : f32 to vector<256x128xf32>
      %c0_11 = arith.constant 0 : index
      %c0_12 = arith.constant 0 : index
      %13 = vector.load %arg7[%c0_11, %c0_12] : memref<256x128xf32, #tpu.memory_space<vmem>>, vector<256x128xf32>
      tpu.vector_store %arg7[%c0_11, %c0_12], %12 {strides = array<i32>} : memref<256x128xf32, #tpu.memory_space<vmem>>, vector<256x128xf32>,
    } else {
    }
    %c0 = arith.constant 0 : index
    %c0_1 = arith.constant 0 : index
    %3 = vector.load %arg7[%c0, %c0_1] : memref<256x128xf32, #tpu.memory_space<vmem>>, vector<256x128xf32>
    %c0_2 = arith.constant 0 : index
    %c0_3 = arith.constant 0 : index
    %4 = vector.load %arg3[%c0_2, %c0_3] : memref<256x36xbf16, #tpu.memory_space<vmem>>, vector<256x36xbf16>
    %c0_4 = arith.constant 0 : index
    %c0_5 = arith.constant 0 : index
    %5 = vector.load %arg4[%c0_4, %c0_5] : memref<36x128xbf16, #tpu.memory_space<vmem>>, vector<36x128xbf16>
    %cst = arith.constant dense<0.000000e+00> : vector<256x128xf32>
    %6 = tpu.matmul %4, %5, %cst {dimension_numbers = #tpu.dot_dimension_numbers<[1], [0], [0], [1], [0, 0, 1, 1], [], []>} : vector<256x36xbf16>, vector<36x128xbf16>, vector<256x128xf32> -> vector<256x128xf32>
    %7 = arith.addf %3, %6 : vector<256x128xf32>
    %c0_6 = arith.constant 0 : index
    %c0_7 = arith.constant 0 : index
    %8 = vector.load %arg7[%c0_6, %c0_7] : memref<256x128xf32, #tpu.memory_space<vmem>>, vector<256x128xf32>
    tpu.vector_store %arg7[%c0_6, %c0_7], %7 {strides = array<i32>} : memref<256x128xf32, #tpu.memory_space<vmem>>, vector<256x128xf32>,
    %c0_i32_8 = arith.constant 0 : i32
    %9 = arith.cmpi eq, %arg2, %c0_i32_8 : i32
    %10 = arith.extui %9 : i1 to i32
    %c0_i32_9 = arith.constant 0 : i32
    %11 = arith.cmpi ne, %10, %c0_i32_9 : i32
    scf.if %11 {
      %c0_10 = arith.constant 0 : index
      %c0_11 = arith.constant 0 : index
      %12 = vector.load %arg7[%c0_10, %c0_11] : memref<256x128xf32, #tpu.memory_space<vmem>>, vector<256x128xf32>
      %c0_12 = arith.constant 0 : index
      %c0_13 = arith.constant 0 : index
      %13 = vector.load %arg5[%c0_12, %c0_13] : memref<1x128xf32, #tpu.memory_space<vmem>>, vector<1x128xf32>
      %14 = vector.broadcast %13 : vector<1x128xf32> to vector<256x128xf32>
      %15 = arith.addf %12, %14 : vector<256x128xf32>
      %c0_14 = arith.constant 0 : index
      %c0_15 = arith.constant 0 : index
      %16 = vector.load %arg6[%c0_14, %c0_15] : memref<256x128xf32, #tpu.memory_space<vmem>>, vector<256x128xf32>
      tpu.vector_store %arg6[%c0_14, %c0_15], %15 {strides = array<i32>} : memref<256x128xf32, #tpu.memory_space<vmem>>, vector<256x128xf32>,
    } else {
    }
    return
  }
  func.func @transform_0(%arg0: i32, %arg1: i32, %arg2: i32) -> (i32, i32) {
    %c0_i32 = arith.constant 0 : i32
    return %arg0, %arg2 : i32, i32
  }
  func.func @transform_1(%arg0: i32, %arg1: i32, %arg2: i32) -> (i32, i32) {
    %c0_i32 = arith.constant 0 : i32
    return %arg2, %arg1 : i32, i32
  }
  func.func @transform_2(%arg0: i32, %arg1: i32, %arg2: i32) -> (i32, i32) {
    %c0_i32 = arith.constant 0 : i32
    %c0_i32_0 = arith.constant 0 : i32
    return %c0_i32, %arg1 : i32, i32
  }
  func.func @transform_3(%arg0: i32, %arg1: i32, %arg2: i32) -> (i32, i32) {
    %c0_i32 = arith.constant 0 : i32
    return %arg0, %arg1 : i32, i32
  }
}

</mosaic_0001>

<bundles_post_ra>
// kernel: _bayes_conv_forward.1
= control target key start
LH: loop header
LB: loop body
LE: loop exit
PB: predicated region body
PF: predicated region fallthrough
CT: control target
= control target key end

     0   :  { %s1156_s12 = smov 0   ;;  %s1158_s13 = smov 0   ;;  %s1307_s0 = inlined_call_operand.vmem [shape: bf16[512,36], index: 0, kind: input, shape index: {}]   ;;  %s1308_s1 = inlined_call_operand.vmem [shape: bf16[36,128], index: 1, kind: input, shape index: {}]   ;;  %s1309_s2 = inlined_call_operand.vmem [shape: f32[1,128], index: 2, kind: input, shape index: {}]   ;;  %s1310_s3 = inlined_call_operand.vmem [shape: f32[512,128], index: 3, kind: output, shape index: {}]  }
   0x1   :  { %s1160_s14 = smov 0  }
   0x2 LB: > { %s32_s15 = sadd.s32 1, %s1130_s13  ;;  %p961_p0 = scmp.ge.s32.totalorder %s1134_s14, 1  ;;  %s1134_s14 = sphi %s1160_s14, %s13_s14   ;;  %s1130_s13 = sphi %s1158_s13, %s1312_s13   ;;  %s1126_s12 = sphi %s1156_s12, %s1311_s12  }
   0x3   : > { %p34_p1 = scmp.ge.s32.totalorder %s32_s15, 2  ;;  %p188_p2 = scmp.lt.s32.totalorder %s1134_s14, 3 }
   0x5   : > { %s1314_s15 = smov (%p34_p1, %s32_s15), 0  ;;  %p189_p3 = pnand %p961_p0, %p188_p2 }
   0x6   : > { %v1093_v0 = vld [vmem:[%s1308_s1] sm:$0xff] (!%p189_p3)   ;;  %v1094_v1 = vld [vmem:[%s1308_s1 + $0x8] sm:$0xff] (!%p189_p3)   ;;  %s962_s20 = sshll.u32 (!%p189_p3), %s1126_s12, 5  ;;  %v1095_v2 = vld [vmem:[%s1308_s1 + $0x10] ss:$0 sps:$4 sm:$0x33] (!%p189_p3)  }
   0x7   : > { %192 = sbr.rel (%p189_p3) target bundleno = 262 (0x106), region = 32  ;;  %1023 = vmatprep.subr.bf16.mxu0 (!%p189_p3), %v1093_v0  ;;  %1061 = vmatprep.subr.bf16.mxu1 (!%p189_p3), %v1093_v0  ;;  %p230_p4 = scmp.lt.s32.totalorder (!%p189_p3), %s962_s20, 63  ;;  %vm509_vm0 = vcmask (!%p189_p3), 1041408   ;;  %vm460_vm1 = vcmask (!%p189_p3), 293888   ;;  %v1227_v20 = vld [vmem:[%s1309_s2] ss:$0 sm:$0xff] (!%p189_p3) }
   0x8   : > { %1024 = vmatpush3.bf16.msra.mxu0 (!%p189_p3), %v1093_v0  ;;  %1064 = vmatpush3.bf16.msra.mxu1 (!%p189_p3), %v1093_v0  ;;  %v511_v3 = vsel (!%p189_p3), %vm509_vm0, %v1095_v2, 0 }
   0x9   : > { %1025 = vmatprep.subr.bf16.mxu0 (!%p189_p3), %v1094_v1  ;;  %1062 = vmatprep.subr.bf16.mxu1 (!%p189_p3), %v1094_v1 }
   0xc   : > { %1026 = vmatpush3.bf16.msra.mxu0 (!%p189_p3), %v1094_v1  ;;  %1065 = vmatpush3.bf16.msra.mxu1 (!%p189_p3), %v1094_v1 }
   0xd   : > { %1067 = vmatprep.subr.msk.bf16.mxu0 (!%p189_p3), %vm509_vm0, %v1095_v2  ;;  %1068 = vmatprep.subr.msk.bf16.mxu1 (!%p189_p3), %vm509_vm0, %v1095_v2 }
   0xe   : > { %s1316_s20 = smov (!%p230_p4, %s962_s20), 63 }
   0xf   : > { %s963_s23 = sshll.u32 %s1316_s20, 2  ;;  %s965_s27 = sshll.u32 %s1316_s20, 3 }
  0x10   : > { %s1189_s26 = scalar_lea.vmem %s1307_s0, %s963_s23  ;;  %1028 = vmatpush3.bf16.msra.mxu0 %v511_v3  ;;  %1066 = vmatpush3.bf16.msra.mxu1 %v511_v3  ;;  %s1232_s5 = scalar_lea.vmem %s1310_s3, %s965_s27 }
  0x11   : > { %v1096_v4 = vld [vmem:[%s1189_s26] sm:$0xff]   ;;  %v1098_v6 = vld [vmem:[%s1189_s26 + $0x8] sm:$0xff]   ;;  %v1100_v8 = vld [vmem:[%s1189_s26 + $0x10] sm:$0xff]  }
  0x12   : > { %v1097_v5 = vld [vmem:[%s1189_s26 + $0x40] sm:$0xff]   ;;  %1029 = vmatprep.mubr.msk.bf16.mxu0 %vm460_vm1, %v1096_v4  ;;  %v1099_v7 = vld [vmem:[%s1189_s26 + $0x48] sm:$0xff]   ;;  %v1101_v9 = vld [vmem:[%s1189_s26 + $0x50] sm:$0xff]  }
  0x13   : > { %1045 = vmatprep.mubr.msk.bf16.mxu1 %vm460_vm1, %v1097_v5  ;;  %1030 = vmatmul.mubr.msk.bf16.vlgmr.msra.gmra.mrb[0].mxu0 %vm460_vm1, %v1098_v6  ;;  %v1102_v10 = vld [vmem:[%s1189_s26 + $0x18] sm:$0xff]   ;;  %v1104_v12 = vld [vmem:[%s1189_s26 + $0x20] sm:$0xff]   ;;  %v1106_v14 = vld [vmem:[%s1189_s26 + $0x28] sm:$0xff]  }
  0x14   : > { %1046 = vmatmul.mubr.msk.bf16.vlgmr.msra.gmra.mrb[0].mxu1 %vm460_vm1, %v1099_v7  ;;  %1033 = vmatprep.mubr.msk.bf16.mxu0 %vm460_vm1, %v1100_v8  ;;  %v1103_v11 = vld [vmem:[%s1189_s26 + $0x58] sm:$0xff]   ;;  %v1105_v13 = vld [vmem:[%s1189_s26 + $0x60] sm:$0xff]   ;;  %v1107_v15 = vld [vmem:[%s1189_s26 + $0x68] sm:$0xff]  }
  0x15   : > { %1049 = vmatprep.mubr.msk.bf16.mxu1 %vm460_vm1, %v1101_v9  ;;  %v1108_v16 = vld [vmem:[%s1189_s26 + $0x30] sm:$0xff]   ;;  %v1110_v18 = vld [vmem:[%s1189_s26 + $0x38] sm:$0xff]  }
  0x16   : > { %v1109_v17 = vld [vmem:[%s1189_s26 + $0x70] sm:$0xff]   ;;  %v1111_v19 = vld [vmem:[%s1189_s26 + $0x78] sm:$0xff]  }
  0x1b   : > { %1034 = vmatmul.mubr.msk.bf16.gmra.mrb[4].mxu0 %vm460_vm1, %v1102_v10 }
  0x1c   : > { %1050 = vmatmul.mubr.msk.bf16.gmra.mrb[4].mxu1 %vm460_vm1, %v1103_v11  ;;  %1037 = vmatprep.mubr.msk.bf16.mxu0 %vm460_vm1, %v1104_v12 }
  0x1d   : > { %1053 = vmatprep.mubr.msk.bf16.mxu1 %vm460_vm1, %v1105_v13 }
  0x23   : > { %1038 = vmatmul.mubr.msk.bf16.gmra.mrb[8].mxu0 %vm460_vm1, %v1106_v14 }
  0x24   : > { %1054 = vmatmul.mubr.msk.bf16.gmra.mrb[8].mxu1 %vm460_vm1, %v1107_v15  ;;  %1041 = vmatprep.mubr.msk.bf16.mxu0 %vm460_vm1, %v1108_v16 }
  0x25   : > { %1057 = vmatprep.mubr.msk.bf16.mxu1 %vm460_vm1, %v1109_v17 }
  0x2b   : > { %1042 = vmatmul.mubr.msk.bf16.gmra.mrb[12].mxu0 %vm460_vm1, %v1110_v18 }
  0x2c   : > { %1058 = vmatmul.mubr.msk.bf16.gmra.mrb[12].mxu1 %vm460_vm1, %v1111_v19 }
  0xe6   : > { %v1031_v21 = vpop.f32.mrb[0].mxu0 }
  0xe7   : > { %v1047_v22 = vpop.f32.mrb[0].mxu1  ;;  %v782_v23 = vadd.f32 %v1031_v21, %v1227_v20  ;;  %v547_v25 = vpop.f32.mrb[1].mxu0 }
  0xe8   : > { %v798_v24 = vadd.f32 %v1047_v22, %v1227_v20  ;;  %v611_v26 = vpop.f32.mrb[1].mxu1  ;;  %v780_v27 = vadd.f32 %v1227_v20, %v547_v25  ;;  %v1032_v29 = vpop.f32.mrb[2].mxu0 }
  0xe9   : > { %v796_v28 = vadd.f32 %v1227_v20, %v611_v26  ;;  %v1048_v30 = vpop.f32.mrb[2].mxu1  ;;  %814 = vst [vmem:[%s1232_s5 + $0x10] sm:$0xff] %v782_v23  ;;  %v783_v31 = vadd.f32 %v1032_v29, %v1227_v20  ;;  %v550_v33 = vpop.f32.mrb[3].mxu0 }
  0xea   : > { %830 = vst [vmem:[%s1232_s5 + $0x90] sm:$0xff] %v798_v24  ;;  %v799_v32 = vadd.f32 %v1048_v30, %v1227_v20  ;;  %v614_v34 = vpop.f32.mrb[3].mxu1  ;;  %812 = vst [vmem:[%s1232_s5] sm:$0xff] %v780_v27  ;;  %v781_v35 = vadd.f32 %v1227_v20, %v550_v33 }
  0xeb   : > { %828 = vst [vmem:[%s1232_s5 + $0x80] sm:$0xff] %v796_v28  ;;  %v797_v36 = vadd.f32 %v1227_v20, %v614_v34  ;;  %815 = vst [vmem:[%s1232_s5 + $0x18] sm:$0xff] %v783_v31 }
  0xec   : > { %831 = vst [vmem:[%s1232_s5 + $0x98] sm:$0xff] %v799_v32  ;;  %813 = vst [vmem:[%s1232_s5 + $0x8] sm:$0xff] %v781_v35 }
  0xed   : > { %829 = vst [vmem:[%s1232_s5 + $0x88] sm:$0xff] %v797_v36 }
  0xee   : > { %v1035_v37 = vpop.f32.mrb[4].mxu0 }
  0xef   : > { %v1051_v38 = vpop.f32.mrb[4].mxu1  ;;  %v786_v39 = vadd.f32 %v1035_v37, %v1227_v20  ;;  %v563_v41 = vpop.f32.mrb[5].mxu0 }
  0xf0   : > { %v802_v40 = vadd.f32 %v1051_v38, %v1227_v20  ;;  %v627_v42 = vpop.f32.mrb[5].mxu1  ;;  %v784_v43 = vadd.f32 %v1227_v20, %v563_v41  ;;  %v1036_v45 = vpop.f32.mrb[6].mxu0 }
  0xf1   : > { %v800_v44 = vadd.f32 %v1227_v20, %v627_v42  ;;  %v1052_v46 = vpop.f32.mrb[6].mxu1  ;;  %818 = vst [vmem:[%s1232_s5 + $0x30] sm:$0xff] %v786_v39  ;;  %v787_v47 = vadd.f32 %v1036_v45, %v1227_v20  ;;  %v566_v49 = vpop.f32.mrb[7].mxu0 }
  0xf2   : > { %834 = vst [vmem:[%s1232_s5 + $0xb0] sm:$0xff] %v802_v40  ;;  %v803_v48 = vadd.f32 %v1052_v46, %v1227_v20  ;;  %v630_v50 = vpop.f32.mrb[7].mxu1  ;;  %816 = vst [vmem:[%s1232_s5 + $0x20] sm:$0xff] %v784_v43  ;;  %v785_v51 = vadd.f32 %v1227_v20, %v566_v49 }
  0xf3   : > { %832 = vst [vmem:[%s1232_s5 + $0xa0] sm:$0xff] %v800_v44  ;;  %v801_v52 = vadd.f32 %v1227_v20, %v630_v50  ;;  %819 = vst [vmem:[%s1232_s5 + $0x38] sm:$0xff] %v787_v47 }
  0xf4   : > { %835 = vst [vmem:[%s1232_s5 + $0xb8] sm:$0xff] %v803_v48  ;;  %817 = vst [vmem:[%s1232_s5 + $0x28] sm:$0xff] %v785_v51 }
  0xf5   : > { %833 = vst [vmem:[%s1232_s5 + $0xa8] sm:$0xff] %v801_v52 }
  0xf6   : > { %v1039_v53 = vpop.f32.mrb[8].mxu0 }
  0xf7   : > { %v1055_v54 = vpop.f32.mrb[8].mxu1  ;;  %v790_v55 = vadd.f32 %v1039_v53, %v1227_v20  ;;  %v579_v57 = vpop.f32.mrb[9].mxu0 }
  0xf8   : > { %v806_v56 = vadd.f32 %v1055_v54, %v1227_v20  ;;  %v643_v58 = vpop.f32.mrb[9].mxu1  ;;  %v788_v59 = vadd.f32 %v1227_v20, %v579_v57  ;;  %v1040_v61 = vpop.f32.mrb[10].mxu0 }
  0xf9   : > { %v804_v60 = vadd.f32 %v1227_v20, %v643_v58  ;;  %v1056_v62 = vpop.f32.mrb[10].mxu1  ;;  %822 = vst [vmem:[%s1232_s5 + $0x50] sm:$0xff] %v790_v55  ;;  %v791_v63 = vadd.f32 %v1040_v61, %v1227_v20  ;;  %v582_v1 = vpop.f32.mrb[11].mxu0 }
  0xfa   : > { %838 = vst [vmem:[%s1232_s5 + $0xd0] sm:$0xff] %v806_v56  ;;  %v807_v0 = vadd.f32 %v1056_v62, %v1227_v20  ;;  %v646_v2 = vpop.f32.mrb[11].mxu1  ;;  %820 = vst [vmem:[%s1232_s5 + $0x40] sm:$0xff] %v788_v59  ;;  %v789_v3 = vadd.f32 %v1227_v20, %v582_v1 }
  0xfb   : > { %836 = vst [vmem:[%s1232_s5 + $0xc0] sm:$0xff] %v804_v60  ;;  %v805_v4 = vadd.f32 %v1227_v20, %v646_v2  ;;  %823 = vst [vmem:[%s1232_s5 + $0x58] sm:$0xff] %v791_v63 }
  0xfc   : > { %839 = vst [vmem:[%s1232_s5 + $0xd8] sm:$0xff] %v807_v0  ;;  %821 = vst [vmem:[%s1232_s5 + $0x48] sm:$0xff] %v789_v3 }
  0xfd   : > { %837 = vst [vmem:[%s1232_s5 + $0xc8] sm:$0xff] %v805_v4 }
  0xfe   : > { %v1043_v5 = vpop.f32.mrb[12].mxu0 }
  0xff   : > { %v1059_v6 = vpop.f32.mrb[12].mxu1  ;;  %v794_v7 = vadd.f32 %v1043_v5, %v1227_v20  ;;  %v595_v9 = vpop.f32.mrb[13].mxu0 }
 0x100   : > { %v810_v8 = vadd.f32 %v1059_v6, %v1227_v20  ;;  %v659_v10 = vpop.f32.mrb[13].mxu1  ;;  %v792_v11 = vadd.f32 %v1227_v20, %v595_v9  ;;  %v1044_v13 = vpop.f32.mrb[14].mxu0 }
 0x101   : > { %v808_v12 = vadd.f32 %v1227_v20, %v659_v10  ;;  %v1060_v14 = vpop.f32.mrb[14].mxu1  ;;  %826 = vst [vmem:[%s1232_s5 + $0x70] sm:$0xff] %v794_v7  ;;  %v795_v15 = vadd.f32 %v1044_v13, %v1227_v20  ;;  %v598_v17 = vpop.f32.mrb[15].mxu0 }
 0x102   : > { %842 = vst [vmem:[%s1232_s5 + $0xf0] sm:$0xff] %v810_v8  ;;  %v811_v16 = vadd.f32 %v1060_v14, %v1227_v20  ;;  %v662_v18 = vpop.f32.mrb[15].mxu1  ;;  %824 = vst [vmem:[%s1232_s5 + $0x60] sm:$0xff] %v792_v11  ;;  %v793_v19 = vadd.f32 %v1227_v20, %v598_v17 }
 0x103   : > { %840 = vst [vmem:[%s1232_s5 + $0xe0] sm:$0xff] %v808_v12  ;;  %v809_v21 = vadd.f32 %v1227_v20, %v662_v18  ;;  %827 = vst [vmem:[%s1232_s5 + $0x78] sm:$0xff] %v795_v15 }
 0x104   : > { %843 = vst [vmem:[%s1232_s5 + $0xf8] sm:$0xff] %v811_v16  ;;  %825 = vst [vmem:[%s1232_s5 + $0x68] sm:$0xff] %v793_v19 }
 0x105   : > { %841 = vst [vmem:[%s1232_s5 + $0xe8] sm:$0xff] %v809_v21 }
 0x106 PF: > { %s13_s14 = sadd.s32 1, %s1134_s14   ;;  %s1311_s12 = smov %s1130_s13 }
 0x107   : > { %p10_p5 = scmp.ge.s32.totalorder %s13_s14, 4   ;;  %s1312_s13 = smov %s1314_s15 }
 0x109   :  { %12 = sbr.rel (!%p10_p5) target bundleno = 2 (0x2), region = 76 }

</bundles_post_ra>
